<compile_context>
chip_gen: v6e
topology: v6e:2x2x1
jax: 0.10.0
libtpu: 0.0.40
codegen_flags: <defaults>
</compile_context>

<pallas_src>
import jax
import jax.numpy as jnp
from jax.experimental import pallas as pl
from jax.experimental.pallas import tpu as pltpu


def _round_up(n, m):
    return ((n + m - 1) // m) * m


# --------------------------------- fused kernel --------------------------------------
def make_fused_kernel(D0, L, stride, conv_cins, num_lstm, H, O, mxu_dtype=jnp.float32):
    """Fused CNN -> LSTM -> Linear kernel.

    Ref order (positional):
      x_ref (D0, L, Cin0),
      (conv_wflat (3*Cin_l, Cout), conv_b (1, Cout)) * num_conv,
      (lstm_Wx (in_l, 4H), lstm_Wh (H, 4H), lstm_b (1, 4H)) * num_lstm,   # b = b_ih + b_hh
      wd (H, O), bd (1, O),
      o_ref (D0*L, O),
      pad_ref (D0*stride + 8, max_cin)        # shared VMEM scratch (in-kernel zero padding)
    """
    T, B = D0, L
    num_conv = len(conv_cins)
    N = D0 * stride                    # rows of the batched conv matmul (multiple of 8)

    if mxu_dtype == jnp.float32:
        cast = lambda v: v
    else:
        cast = lambda v: v.astype(mxu_dtype)

    def kernel(*refs):
        i = 0
        x_ref = refs[i]; i += 1
        conv_refs = [(refs[i + 2 * l], refs[i + 2 * l + 1]) for l in range(num_conv)]
        i += 2 * num_conv
        lstm_refs = [(refs[i + 3 * l], refs[i + 3 * l + 1], refs[i + 3 * l + 2])
                     for l in range(num_lstm)]
        i += 3 * num_lstm
        wd_ref, bd_ref = refs[i], refs[i + 1]; i += 2
        o_ref = refs[i]; i += 1
        pad_ref = refs[i]

        # Zero the shared pad scratch ONCE.  Pad / alignment rows are never overwritten,
        # so they stay zero for every conv layer (no per-layer full-buffer zeroing).
        pad_ref[...] = jnp.zeros_like(pad_ref)

        # -------- CNN encoder: kernel=3, padding=1, conv along L, batched over D0 -----
        cin0 = conv_cins[0]
        for d in range(D0):  # scatter input rows into the aligned slabs (static slices)
            pad_ref[d * stride + 1: d * stride + 1 + L, 0:cin0] = x_ref[d]

        y = None
        for l in range(num_conv):
            cin = conv_cins[l]
            w_ref, b_ref = conv_refs[l]
            if l > 0:
                # Scatter the previous layer's valid rows back into the (still zero-
                # padded) slabs; only the L data rows per sample are written.
                for d in range(D0):
                    pad_ref[d * stride + 1: d * stride + 1 + L, 0:cin] = \
                        y[d * stride: d * stride + L, :]
            # ONE MXU push per conv layer over ALL samples: the 3 taps are sublane-
            # shifted views of the flat pad buffer, lane-concatenated so the layer is a
            # single (N, 3*cin) @ (3*cin, cout) matmul.  Rows at pad / alignment
            # positions produce garbage outputs that are never read back (zero pad rows
            # keep samples from mixing).
            xcat = jnp.concatenate([pad_ref[k: k + N, 0:cin] for k in range(3)], axis=1)
            y = (jnp.dot(cast(xcat), w_ref[...], preferred_element_type=jnp.float32)
                 + b_ref[...])

        # Gather the valid rows, time-major: (T*B, cnn_hidden) LSTM input.
        x_seq = jnp.concatenate([y[d * stride: d * stride + L, :] for d in range(D0)],
                                axis=0)

        # -------- LSTM encoder: layer-major loops, batched input projection -----------
        # TODO(synk): for large T replace the unrolled time loop with lax.fori_loop plus
        # a VMEM scratch accumulator for the per-step hidden states (vreg pressure).
        for l in range(num_lstm):
            wx_ref, wh_ref, b_ref = lstm_refs[l]
            Wh = wh_ref[...]                      # hoisted out of the time loop
            # Whole-sequence input projection: one (T*B, in_l) @ (in_l, 4H) matmul +
            # bias, off the serial recurrence (no per-step x-proj, no per-step concat).
            xg = (jnp.dot(cast(x_seq), wx_ref[...], preferred_element_type=jnp.float32)
                  + b_ref[...])
            h = jnp.zeros((B, H), jnp.float32)
            c = jnp.zeros((B, H), jnp.float32)
            outs = []
            for t in range(T):
                gates = xg[t * B:(t + 1) * B, :] + jnp.dot(
                    cast(h), Wh, preferred_element_type=jnp.float32)       # (B, 4H)
                # Full-width activations: 2 EUP pushes over the whole (B, 4H) vreg
                # instead of 4 narrow-slice ones.  PyTorch gate order: i, f, g, o.
                s_all = jax.nn.sigmoid(gates)
                t_all = jnp.tanh(gates)
                i_g = s_all[:, 0:H]
                f_g = s_all[:, H:2 * H]
                g_g = t_all[:, 2 * H:3 * H]
                o_g = s_all[:, 3 * H:4 * H]
                c = f_g * c + i_g * g_g
                h = o_g * jnp.tanh(c)
                outs.append(h)
            x_seq = jnp.concatenate(outs, axis=0)                          # (T*B, H)

        # -------- decoder: one (T*B, H) @ (H, O) matmul, 2-D relayout-free store ------
        o_ref[...] = (jnp.dot(cast(x_seq), wd_ref[...],
                              preferred_element_type=jnp.float32) + bd_ref[...])

    return kernel


def cnn_lstm_forward(x, params, mxu_dtype=jnp.float32):
    """x: (D0, D1, input_size) -> (D0, D1, output_size) via a single fused pallas_call.

    mxu_dtype=jnp.bfloat16 casts MXU weight/activation operands to bf16 (f32 accumulation
    and f32 gate math kept) -- the right setting on v6e/v7x at scale.  Default f32 so the
    strict f32 reference check holds exactly (and v5e has no bf16 VPU/EUP).
    """
    D0, L, _ = x.shape
    H = params["H"]
    O = params["wd"].shape[-1]
    stride = _round_up(L + 2, 8)        # aligned per-sample slab stride in the pad scratch

    flat = [x]
    conv_cins = []
    for (w3, b) in params["conv"]:
        k, cin, cout = w3.shape
        conv_cins.append(cin)
        flat.append(w3.reshape(k * cin, cout).astype(mxu_dtype))   # tap-flattened weight
        flat.append(b)                                             # bias stays f32
    for (wi, wh, b) in params["lstm"]:
        flat.append(wi.astype(mxu_dtype))   # W_x (in_l, 4H)  -- split, no per-step concat
        flat.append(wh.astype(mxu_dtype))   # W_h (H, 4H)
        flat.append(b)                      # b_ih + b_hh, f32
    flat.append(params["wd"].astype(mxu_dtype))
    flat.append(params["bd"])

    # ONE shared pad scratch reused by all conv layers: per-sample slab of `stride` rows
    # (multiple of 8), data at rows 1..L, zero pad rows 0 and L+1; +8 tail rows so the 3
    # sublane-shifted tap views of length D0*stride stay in bounds.
    max_cin = max(conv_cins)
    scratch = [pltpu.VMEM((D0 * stride + 8, max_cin), jnp.float32)]

    kernel = make_fused_kernel(D0, L, stride, conv_cins, len(params["lstm"]), H, O,
                               mxu_dtype)
    # No grid: all operands are tiny and fit whole in VMEM.
    # TODO(synk): when scaling up, add a "parallel" grid axis over the batch (L) dimension
    # only (the time recurrence must stay on one core), pad the output lane dim toward
    # 128, and budget VMEM for v7x's 64 MiB via pltpu.CompilerParams(vmem_limit_bytes=...).
    out2d = pl.pallas_call(
        kernel,
        out_shape=jax.ShapeDtypeStruct((D0 * L, O), jnp.float32),  # 2-D, no in-kernel reshape
        scratch_shapes=scratch,
    )(*flat)
    return out2d.reshape(D0, L, O)


# ------------------------------- pure-JAX reference ----------------------------------
def _conv1d_k3_ref(x, w3, b):
    D0, L, _ = x.shape
    xp = jnp.pad(x, ((0, 0), (1, 1), (0, 0)))
    acc = 0.0
    for k in range(3):
        acc = acc + jnp.einsum('nlc,co->nlo', xp[:, k:k + L, :], w3[k])
    return acc + b[None]


def cnn_lstm_ref(x, params):
    h = x
    for (w3, b) in params["conv"]:
        h = _conv1d_k3_ref(h, w3, b)
    T, B, _ = h.shape
    H = params["H"]
    L = len(params["lstm"])
    hs = [jnp.zeros((B, H), jnp.float32) for _ in range(L)]
    cs = [jnp.zeros((B, H), jnp.float32) for _ in range(L)]
    outs = []
    for t in range(T):
        inp = h[t]
        for l, (wi, wh, b) in enumerate(params["lstm"]):
            gates = inp @ wi + hs[l] @ wh + b
            i_g = jax.nn.sigmoid(gates[:, 0:H])
            f_g = jax.nn.sigmoid(gates[:, H:2 * H])
            g_g = jnp.tanh(gates[:, 2 * H:3 * H])
            o_g = jax.nn.sigmoid(gates[:, 3 * H:4 * H])
            cs[l] = f_g * cs[l] + i_g * g_g
            hs[l] = o_g * jnp.tanh(cs[l])
            inp = hs[l]
        outs.append(inp @ params["wd"] + params["bd"])
    return jnp.stack(outs, axis=0)


# --------------------------------------- main ----------------------------------------
if __name__ == "__main__":
    input_size = 4
    cnn_hidden = 32
    lstm_hidden = 32
    cnn_num_layer = 2
    lstm_num_layer = 2
    output_size = 8
    D0, D1 = 2, 8  # x: (D0, D1, input_size); conv length = D1, LSTM seq = D0, batch = D1

    keys = iter(jax.random.split(jax.random.PRNGKey(0), 64))

    def uniform(shape, scale):
        return jax.random.uniform(next(keys), shape, jnp.float32, -scale, scale)

    # deterministic parameter init (PyTorch-style uniform(-1/sqrt(fan_in), +1/sqrt(fan_in)))
    conv_params = []
    cin = input_size
    for _ in range(cnn_num_layer):
        s = 1.0 / (cin * 3) ** 0.5
        conv_params.append((uniform((3, cin, cnn_hidden), s), uniform((1, cnn_hidden), s)))
        cin = cnn_hidden

    lstm_params = []
    in_l = cnn_hidden
    s = 1.0 / lstm_hidden ** 0.5
    for _ in range(lstm_num_layer):
        wi = uniform((in_l, 4 * lstm_hidden), s)
        wh = uniform((lstm_hidden, 4 * lstm_hidden), s)
        b = uniform((1, 4 * lstm_hidden), s) + uniform((1, 4 * lstm_hidden), s)  # b_ih + b_hh
        lstm_params.append((wi, wh, b))
        in_l = lstm_hidden

    wd = uniform((lstm_hidden, output_size), 1.0 / lstm_hidden ** 0.5)
    bd = uniform((1, output_size), 1.0 / lstm_hidden ** 0.5)

    params = {"conv": conv_params, "lstm": lstm_params, "wd": wd, "bd": bd, "H": lstm_hidden}

    x = jax.random.normal(next(keys), (D0, D1, input_size), jnp.float32)

    out = jax.block_until_ready(cnn_lstm_forward(x, params))
    assert out.shape == (D0, D1, output_size), out.shape

    ref = cnn_lstm_ref(x, params)
    max_err = float(jnp.max(jnp.abs(out - ref)))
    if max_err > 1e-2:
        raise RuntimeError(f"mismatch vs reference: max |err| = {max_err}")

    print("KERNEL_OK")
</pallas_src>

<mosaic_0001>
module attributes {stable_mosaic.version = 11 : i64} {
  func.func @kernel(%arg0: memref<2x8x4xf32, #tpu.memory_space<vmem>>, %arg1: memref<12x32xf32, #tpu.memory_space<vmem>>, %arg2: memref<1x32xf32, #tpu.memory_space<vmem>>, %arg3: memref<96x32xf32, #tpu.memory_space<vmem>>, %arg4: memref<1x32xf32, #tpu.memory_space<vmem>>, %arg5: memref<32x128xf32, #tpu.memory_space<vmem>>, %arg6: memref<32x128xf32, #tpu.memory_space<vmem>>, %arg7: memref<1x128xf32, #tpu.memory_space<vmem>>, %arg8: memref<32x128xf32, #tpu.memory_space<vmem>>, %arg9: memref<32x128xf32, #tpu.memory_space<vmem>>, %arg10: memref<1x128xf32, #tpu.memory_space<vmem>>, %arg11: memref<32x8xf32, #tpu.memory_space<vmem>>, %arg12: memref<1x8xf32, #tpu.memory_space<vmem>>, %arg13: memref<16x8xf32, #tpu.memory_space<vmem>>, %arg14: memref<40x32xf32, #tpu.memory_space<vmem>>) attributes {dimension_semantics = [], scalar_prefetch = 0 : i64, scratch_operands = 1 : i64, tpu.core_type = #tpu.core_type<tc>} {
    %cst = arith.constant 0.000000e+00 : f32
    %0 = vector.broadcast %cst : f32 to vector<40x32xf32>
    %c0 = arith.constant 0 : index
    %c0_0 = arith.constant 0 : index
    %1 = vector.load %arg14[%c0, %c0_0] : memref<40x32xf32, #tpu.memory_space<vmem>>, vector<40x32xf32>
    tpu.vector_store %arg14[%c0, %c0_0], %0 {strides = array<i32>} : memref<40x32xf32, #tpu.memory_space<vmem>>, vector<40x32xf32>,
    %c0_1 = arith.constant 0 : index
    %c0_2 = arith.constant 0 : index
    %c0_3 = arith.constant 0 : index
    %2 = vector.load %arg0[%c0_1, %c0_2, %c0_3] : memref<2x8x4xf32, #tpu.memory_space<vmem>>, vector<1x8x4xf32>
    %3 = vector.shape_cast %2 : vector<1x8x4xf32> to vector<8x4xf32>
    %c1 = arith.constant 1 : index
    %c0_4 = arith.constant 0 : index
    %4 = vector.load %arg14[%c1, %c0_4] : memref<40x32xf32, #tpu.memory_space<vmem>>, vector<8x4xf32>
    tpu.vector_store %arg14[%c1, %c0_4], %3 {strides = array<i32>} : memref<40x32xf32, #tpu.memory_space<vmem>>, vector<8x4xf32>,
    %c1_5 = arith.constant 1 : index
    %c0_6 = arith.constant 0 : index
    %c0_7 = arith.constant 0 : index
    %5 = vector.load %arg0[%c1_5, %c0_6, %c0_7] : memref<2x8x4xf32, #tpu.memory_space<vmem>>, vector<1x8x4xf32>
    %6 = vector.shape_cast %5 : vector<1x8x4xf32> to vector<8x4xf32>
    %c17 = arith.constant 17 : index
    %c0_8 = arith.constant 0 : index
    %7 = vector.load %arg14[%c17, %c0_8] : memref<40x32xf32, #tpu.memory_space<vmem>>, vector<8x4xf32>
    tpu.vector_store %arg14[%c17, %c0_8], %6 {strides = array<i32>} : memref<40x32xf32, #tpu.memory_space<vmem>>, vector<8x4xf32>,
    %c0_9 = arith.constant 0 : index
    %c0_10 = arith.constant 0 : index
    %8 = vector.load %arg14[%c0_9, %c0_10] : memref<40x32xf32, #tpu.memory_space<vmem>>, vector<32x4xf32>
    %c1_11 = arith.constant 1 : index
    %c0_12 = arith.constant 0 : index
    %9 = vector.load %arg14[%c1_11, %c0_12] : memref<40x32xf32, #tpu.memory_space<vmem>>, vector<32x4xf32>
    %c2 = arith.constant 2 : index
    %c0_13 = arith.constant 0 : index
    %10 = vector.load %arg14[%c2, %c0_13] : memref<40x32xf32, #tpu.memory_space<vmem>>, vector<32x4xf32>
    %11 = tpu.concatenate %8, %9, %10 in 1 : vector<32x4xf32>, vector<32x4xf32>, vector<32x4xf32> -> vector<32x12xf32>
    %c0_14 = arith.constant 0 : index
    %c0_15 = arith.constant 0 : index
    %12 = vector.load %arg1[%c0_14, %c0_15] : memref<12x32xf32, #tpu.memory_space<vmem>>, vector<12x32xf32>
    %cst_16 = arith.constant dense<0.000000e+00> : vector<32x32xf32>
    %13 = tpu.matmul %11, %12, %cst_16 {dimension_numbers = #tpu.dot_dimension_numbers<[1], [0], [0], [1], [0, 0, 1, 1], [], []>} : vector<32x12xf32>, vector<12x32xf32>, vector<32x32xf32> -> vector<32x32xf32>
    %c0_17 = arith.constant 0 : index
    %c0_18 = arith.constant 0 : index
    %14 = vector.load %arg2[%c0_17, %c0_18] : memref<1x32xf32, #tpu.memory_space<vmem>>, vector<1x32xf32>
    %15 = vector.broadcast %14 : vector<1x32xf32> to vector<32x32xf32>
    %16 = arith.addf %13, %15 : vector<32x32xf32>
    %17 = vector.extract_strided_slice %16 {offsets = [0, 0], sizes = [8, 32], strides = [1, 1]} : vector<32x32xf32> to vector<8x32xf32>
    %c1_19 = arith.constant 1 : index
    %c0_20 = arith.constant 0 : index
    %18 = vector.load %arg14[%c1_19, %c0_20] : memref<40x32xf32, #tpu.memory_space<vmem>>, vector<8x32xf32>
    tpu.vector_store %arg14[%c1_19, %c0_20], %17 {strides = array<i32>} : memref<40x32xf32, #tpu.memory_space<vmem>>, vector<8x32xf32>,
    %19 = vector.extract_strided_slice %16 {offsets = [16, 0], sizes = [8, 32], strides = [1, 1]} : vector<32x32xf32> to vector<8x32xf32>
    %c17_21 = arith.constant 17 : index
    %c0_22 = arith.constant 0 : index
    %20 = vector.load %arg14[%c17_21, %c0_22] : memref<40x32xf32, #tpu.memory_space<vmem>>, vector<8x32xf32>
    tpu.vector_store %arg14[%c17_21, %c0_22], %19 {strides = array<i32>} : memref<40x32xf32, #tpu.memory_space<vmem>>, vector<8x32xf32>,
    %c0_23 = arith.constant 0 : index
    %c0_24 = arith.constant 0 : index
    %21 = vector.load %arg14[%c0_23, %c0_24] : memref<40x32xf32, #tpu.memory_space<vmem>>, vector<32x32xf32>
    %c1_25 = arith.constant 1 : index
    %c0_26 = arith.constant 0 : index
    %22 = vector.load %arg14[%c1_25, %c0_26] : memref<40x32xf32, #tpu.memory_space<vmem>>, vector<32x32xf32>
    %c2_27 = arith.constant 2 : index
    %c0_28 = arith.constant 0 : index
    %23 = vector.load %arg14[%c2_27, %c0_28] : memref<40x32xf32, #tpu.memory_space<vmem>>, vector<32x32xf32>
    %24 = tpu.concatenate %21, %22, %23 in 1 : vector<32x32xf32>, vector<32x32xf32>, vector<32x32xf32> -> vector<32x96xf32>
    %c0_29 = arith.constant 0 : index
    %c0_30 = arith.constant 0 : index
    %25 = vector.load %arg3[%c0_29, %c0_30] : memref<96x32xf32, #tpu.memory_space<vmem>>, vector<96x32xf32>
    %cst_31 = arith.constant dense<0.000000e+00> : vector<32x32xf32>
    %26 = tpu.matmul %24, %25, %cst_31 {dimension_numbers = #tpu.dot_dimension_numbers<[1], [0], [0], [1], [0, 0, 1, 1], [], []>} : vector<32x96xf32>, vector<96x32xf32>, vector<32x32xf32> -> vector<32x32xf32>
    %c0_32 = arith.constant 0 : index
    %c0_33 = arith.constant 0 : index
    %27 = vector.load %arg4[%c0_32, %c0_33] : memref<1x32xf32, #tpu.memory_space<vmem>>, vector<1x32xf32>
    %28 = vector.broadcast %27 : vector<1x32xf32> to vector<32x32xf32>
    %29 = arith.addf %26, %28 : vector<32x32xf32>
    %30 = vector.extract_strided_slice %29 {offsets = [0, 0], sizes = [8, 32], strides = [1, 1]} : vector<32x32xf32> to vector<8x32xf32>
    %31 = vector.extract_strided_slice %29 {offsets = [16, 0], sizes = [8, 32], strides = [1, 1]} : vector<32x32xf32> to vector<8x32xf32>
    %32 = tpu.concatenate %30, %31 in 0 : vector<8x32xf32>, vector<8x32xf32> -> vector<16x32xf32>
    %c0_34 = arith.constant 0 : index
    %c0_35 = arith.constant 0 : index
    %33 = vector.load %arg6[%c0_34, %c0_35] : memref<32x128xf32, #tpu.memory_space<vmem>>, vector<32x128xf32>
    %c0_36 = arith.constant 0 : index
    %c0_37 = arith.constant 0 : index
    %34 = vector.load %arg5[%c0_36, %c0_37] : memref<32x128xf32, #tpu.memory_space<vmem>>, vector<32x128xf32>
    %cst_38 = arith.constant dense<0.000000e+00> : vector<16x128xf32>
    %35 = tpu.matmul %32, %34, %cst_38 {dimension_numbers = #tpu.dot_dimension_numbers<[1], [0], [0], [1], [0, 0, 1, 1], [], []>} : vector<16x32xf32>, vector<32x128xf32>, vector<16x128xf32> -> vector<16x128xf32>
    %c0_39 = arith.constant 0 : index
    %c0_40 = arith.constant 0 : index
    %36 = vector.load %arg7[%c0_39, %c0_40] : memref<1x128xf32, #tpu.memory_space<vmem>>, vector<1x128xf32>
    %37 = vector.broadcast %36 : vector<1x128xf32> to vector<16x128xf32>
    %38 = arith.addf %35, %37 : vector<16x128xf32>
    %cst_41 = arith.constant 0.000000e+00 : f32
    %39 = vector.broadcast %cst_41 : f32 to vector<8x32xf32>
    %cst_42 = arith.constant 0.000000e+00 : f32
    %40 = vector.broadcast %cst_42 : f32 to vector<8x32xf32>
    %41 = vector.extract_strided_slice %38 {offsets = [0, 0], sizes = [8, 128], strides = [1, 1]} : vector<16x128xf32> to vector<8x128xf32>
    %cst_43 = arith.constant dense<0.000000e+00> : vector<8x128xf32>
    %42 = tpu.matmul %39, %33, %cst_43 {dimension_numbers = #tpu.dot_dimension_numbers<[1], [0], [0], [1], [0, 0, 1, 1], [], []>} : vector<8x32xf32>, vector<32x128xf32>, vector<8x128xf32> -> vector<8x128xf32>
    %43 = arith.addf %41, %42 : vector<8x128xf32>
    %44 = arith.negf %43 : vector<8x128xf32>
    %45 = math.exp %44 : vector<8x128xf32>
    %cst_44 = arith.constant 1.000000e+00 : f32
    %46 = vector.broadcast %cst_44 : f32 to vector<8x128xf32>
    %47 = arith.addf %46, %45 : vector<8x128xf32>
    %48 = arith.divf %46, %47 : vector<8x128xf32>
    %49 = math.tanh %43 : vector<8x128xf32>
    %50 = vector.extract_strided_slice %48 {offsets = [0, 0], sizes = [8, 32], strides = [1, 1]} : vector<8x128xf32> to vector<8x32xf32>
    %51 = vector.extract_strided_slice %48 {offsets = [0, 32], sizes = [8, 32], strides = [1, 1]} : vector<8x128xf32> to vector<8x32xf32>
    %52 = vector.extract_strided_slice %49 {offsets = [0, 64], sizes = [8, 32], strides = [1, 1]} : vector<8x128xf32> to vector<8x32xf32>
    %53 = vector.extract_strided_slice %48 {offsets = [0, 96], sizes = [8, 32], strides = [1, 1]} : vector<8x128xf32> to vector<8x32xf32>
    %54 = arith.mulf %51, %40 : vector<8x32xf32>
    %55 = arith.mulf %50, %52 : vector<8x32xf32>
    %56 = arith.addf %54, %55 : vector<8x32xf32>
    %57 = math.tanh %56 : vector<8x32xf32>
    %58 = arith.mulf %53, %57 : vector<8x32xf32>
    %59 = vector.extract_strided_slice %38 {offsets = [8, 0], sizes = [8, 128], strides = [1, 1]} : vector<16x128xf32> to vector<8x128xf32>
    %cst_45 = arith.constant dense<0.000000e+00> : vector<8x128xf32>
    %60 = tpu.matmul %58, %33, %cst_45 {dimension_numbers = #tpu.dot_dimension_numbers<[1], [0], [0], [1], [0, 0, 1, 1], [], []>} : vector<8x32xf32>, vector<32x128xf32>, vector<8x128xf32> -> vector<8x128xf32>
    %61 = arith.addf %59, %60 : vector<8x128xf32>
    %62 = arith.negf %61 : vector<8x128xf32>
    %63 = math.exp %62 : vector<8x128xf32>
    %cst_46 = arith.constant 1.000000e+00 : f32
    %64 = vector.broadcast %cst_46 : f32 to vector<8x128xf32>
    %65 = arith.addf %64, %63 : vector<8x128xf32>
    %66 = arith.divf %64, %65 : vector<8x128xf32>
    %67 = math.tanh %61 : vector<8x128xf32>
    %68 = vector.extract_strided_slice %66 {offsets = [0, 0], sizes = [8, 32], strides = [1, 1]} : vector<8x128xf32> to vector<8x32xf32>
    %69 = vector.extract_strided_slice %66 {offsets = [0, 32], sizes = [8, 32], strides = [1, 1]} : vector<8x128xf32> to vector<8x32xf32>
    %70 = vector.extract_strided_slice %67 {offsets = [0, 64], sizes = [8, 32], strides = [1, 1]} : vector<8x128xf32> to vector<8x32xf32>
    %71 = vector.extract_strided_slice %66 {offsets = [0, 96], sizes = [8, 32], strides = [1, 1]} : vector<8x128xf32> to vector<8x32xf32>
    %72 = arith.mulf %69, %56 : vector<8x32xf32>
    %73 = arith.mulf %68, %70 : vector<8x32xf32>
    %74 = arith.addf %72, %73 : vector<8x32xf32>
    %75 = math.tanh %74 : vector<8x32xf32>
    %76 = arith.mulf %71, %75 : vector<8x32xf32>
    %77 = tpu.concatenate %58, %76 in 0 : vector<8x32xf32>, vector<8x32xf32> -> vector<16x32xf32>
    %c0_47 = arith.constant 0 : index
    %c0_48 = arith.constant 0 : index
    %78 = vector.load %arg9[%c0_47, %c0_48] : memref<32x128xf32, #tpu.memory_space<vmem>>, vector<32x128xf32>
    %c0_49 = arith.constant 0 : index
    %c0_50 = arith.constant 0 : index
    %79 = vector.load %arg8[%c0_49, %c0_50] : memref<32x128xf32, #tpu.memory_space<vmem>>, vector<32x128xf32>
    %cst_51 = arith.constant dense<0.000000e+00> : vector<16x128xf32>
    %80 = tpu.matmul %77, %79, %cst_51 {dimension_numbers = #tpu.dot_dimension_numbers<[1], [0], [0], [1], [0, 0, 1, 1], [], []>} : vector<16x32xf32>, vector<32x128xf32>, vector<16x128xf32> -> vector<16x128xf32>
    %c0_52 = arith.constant 0 : index
    %c0_53 = arith.constant 0 : index
    %81 = vector.load %arg10[%c0_52, %c0_53] : memref<1x128xf32, #tpu.memory_space<vmem>>, vector<1x128xf32>
    %82 = vector.broadcast %81 : vector<1x128xf32> to vector<16x128xf32>
    %83 = arith.addf %80, %82 : vector<16x128xf32>
    %cst_54 = arith.constant 0.000000e+00 : f32
    %84 = vector.broadcast %cst_54 : f32 to vector<8x32xf32>
    %cst_55 = arith.constant 0.000000e+00 : f32
    %85 = vector.broadcast %cst_55 : f32 to vector<8x32xf32>
    %86 = vector.extract_strided_slice %83 {offsets = [0, 0], sizes = [8, 128], strides = [1, 1]} : vector<16x128xf32> to vector<8x128xf32>
    %cst_56 = arith.constant dense<0.000000e+00> : vector<8x128xf32>
    %87 = tpu.matmul %84, %78, %cst_56 {dimension_numbers = #tpu.dot_dimension_numbers<[1], [0], [0], [1], [0, 0, 1, 1], [], []>} : vector<8x32xf32>, vector<32x128xf32>, vector<8x128xf32> -> vector<8x128xf32>
    %88 = arith.addf %86, %87 : vector<8x128xf32>
    %89 = arith.negf %88 : vector<8x128xf32>
    %90 = math.exp %89 : vector<8x128xf32>
    %cst_57 = arith.constant 1.000000e+00 : f32
    %91 = vector.broadcast %cst_57 : f32 to vector<8x128xf32>
    %92 = arith.addf %91, %90 : vector<8x128xf32>
    %93 = arith.divf %91, %92 : vector<8x128xf32>
    %94 = math.tanh %88 : vector<8x128xf32>
    %95 = vector.extract_strided_slice %93 {offsets = [0, 0], sizes = [8, 32], strides = [1, 1]} : vector<8x128xf32> to vector<8x32xf32>
    %96 = vector.extract_strided_slice %93 {offsets = [0, 32], sizes = [8, 32], strides = [1, 1]} : vector<8x128xf32> to vector<8x32xf32>
    %97 = vector.extract_strided_slice %94 {offsets = [0, 64], sizes = [8, 32], strides = [1, 1]} : vector<8x128xf32> to vector<8x32xf32>
    %98 = vector.extract_strided_slice %93 {offsets = [0, 96], sizes = [8, 32], strides = [1, 1]} : vector<8x128xf32> to vector<8x32xf32>
    %99 = arith.mulf %96, %85 : vector<8x32xf32>
    %100 = arith.mulf %95, %97 : vector<8x32xf32>
    %101 = arith.addf %99, %100 : vector<8x32xf32>
    %102 = math.tanh %101 : vector<8x32xf32>
    %103 = arith.mulf %98, %102 : vector<8x32xf32>
    %104 = vector.extract_strided_slice %83 {offsets = [8, 0], sizes = [8, 128], strides = [1, 1]} : vector<16x128xf32> to vector<8x128xf32>
    %cst_58 = arith.constant dense<0.000000e+00> : vector<8x128xf32>
    %105 = tpu.matmul %103, %78, %cst_58 {dimension_numbers = #tpu.dot_dimension_numbers<[1], [0], [0], [1], [0, 0, 1, 1], [], []>} : vector<8x32xf32>, vector<32x128xf32>, vector<8x128xf32> -> vector<8x128xf32>
    %106 = arith.addf %104, %105 : vector<8x128xf32>
    %107 = arith.negf %106 : vector<8x128xf32>
    %108 = math.exp %107 : vector<8x128xf32>
    %cst_59 = arith.constant 1.000000e+00 : f32
    %109 = vector.broadcast %cst_59 : f32 to vector<8x128xf32>
    %110 = arith.addf %109, %108 : vector<8x128xf32>
    %111 = arith.divf %109, %110 : vector<8x128xf32>
    %112 = math.tanh %106 : vector<8x128xf32>
    %113 = vector.extract_strided_slice %111 {offsets = [0, 0], sizes = [8, 32], strides = [1, 1]} : vector<8x128xf32> to vector<8x32xf32>
    %114 = vector.extract_strided_slice %111 {offsets = [0, 32], sizes = [8, 32], strides = [1, 1]} : vector<8x128xf32> to vector<8x32xf32>
    %115 = vector.extract_strided_slice %112 {offsets = [0, 64], sizes = [8, 32], strides = [1, 1]} : vector<8x128xf32> to vector<8x32xf32>
    %116 = vector.extract_strided_slice %111 {offsets = [0, 96], sizes = [8, 32], strides = [1, 1]} : vector<8x128xf32> to vector<8x32xf32>
    %117 = arith.mulf %114, %101 : vector<8x32xf32>
    %118 = arith.mulf %113, %115 : vector<8x32xf32>
    %119 = arith.addf %117, %118 : vector<8x32xf32>
    %120 = math.tanh %119 : vector<8x32xf32>
    %121 = arith.mulf %116, %120 : vector<8x32xf32>
    %122 = tpu.concatenate %103, %121 in 0 : vector<8x32xf32>, vector<8x32xf32> -> vector<16x32xf32>
    %c0_60 = arith.constant 0 : index
    %c0_61 = arith.constant 0 : index
    %123 = vector.load %arg11[%c0_60, %c0_61] : memref<32x8xf32, #tpu.memory_space<vmem>>, vector<32x8xf32>
    %cst_62 = arith.constant dense<0.000000e+00> : vector<16x8xf32>
    %124 = tpu.matmul %122, %123, %cst_62 {dimension_numbers = #tpu.dot_dimension_numbers<[1], [0], [0], [1], [0, 0, 1, 1], [], []>} : vector<16x32xf32>, vector<32x8xf32>, vector<16x8xf32> -> vector<16x8xf32>
    %c0_63 = arith.constant 0 : index
    %c0_64 = arith.constant 0 : index
    %125 = vector.load %arg12[%c0_63, %c0_64] : memref<1x8xf32, #tpu.memory_space<vmem>>, vector<1x8xf32>
    %126 = vector.broadcast %125 : vector<1x8xf32> to vector<16x8xf32>
    %127 = arith.addf %124, %126 : vector<16x8xf32>
    %c0_65 = arith.constant 0 : index
    %c0_66 = arith.constant 0 : index
    %128 = vector.load %arg13[%c0_65, %c0_66] : memref<16x8xf32, #tpu.memory_space<vmem>>, vector<16x8xf32>
    tpu.vector_store %arg13[%c0_65, %c0_66], %127 {strides = array<i32>} : memref<16x8xf32, #tpu.memory_space<vmem>>, vector<16x8xf32>,
    return
  }
}

</mosaic_0001>

<bundles_post_ra>
// kernel: tpu_custom_call.1
= control target key start
LH: loop header
LB: loop body
LE: loop exit
PB: predicated region body
PF: predicated region fallthrough
CT: control target
= control target key end

     0   :  { %vm44_vm0 = vcmask 261120   ;;  %vm51_vm1 = vcmask 31744   ;;  %vm131_vm2 = vcmask 1043456   ;;  %v1311_v0 = vmov 0.0   ;;  %s1312_s16 = smov 4   ;;  %s1618_s0 = inlined_call_operand.vmem [shape: f32[2,8,4], index: 0, kind: input, shape index: {}]   ;;  %s1619_s1 = inlined_call_operand.vmem [shape: f32[12,32], index: 1, kind: input, shape index: {}]   ;;  %s1620_s3 = inlined_call_operand.vmem [shape: f32[96,32], index: 3, kind: input, shape index: {}]   ;;  %s1621_s2 = inlined_call_operand.vmem [shape: f32[1,32], index: 2, kind: input, shape index: {}]   ;;  %s1622_s5 = inlined_call_operand.vmem [shape: f32[32,128], index: 5, kind: input, shape index: {}]   ;;  %s1623_s4 = inlined_call_operand.vmem [shape: f32[1,32], index: 4, kind: input, shape index: {}]   ;;  %s1624_s6 = inlined_call_operand.vmem [shape: f32[32,128], index: 6, kind: input, shape index: {}]   ;;  %s1625_s7 = inlined_call_operand.vmem [shape: f32[1,128], index: 7, kind: input, shape index: {}]   ;;  %s1626_s8 = inlined_call_operand.vmem [shape: f32[32,128], index: 8, kind: input, shape index: {}]   ;;  %s1627_s9 = inlined_call_operand.vmem [shape: f32[32,128], index: 9, kind: input, shape index: {}]   ;;  %s1628_s10 = inlined_call_operand.vmem [shape: f32[1,128], index: 10, kind: input, shape index: {}]   ;;  %s1629_s11 = inlined_call_operand.vmem [shape: f32[32,8], index: 11, kind: input, shape index: {}]   ;;  %s1630_s12 = inlined_call_operand.vmem [shape: f32[1,8], index: 12, kind: input, shape index: {}]   ;;  %s1631_s13 = inlined_call_operand.vmem [shape: f32[16,8], index: 13, kind: output, shape index: {}]  }
   0x1   :  { %48 = vst.msk [vmem:[#allocation2 + $0x18] sm:$0xff] %vm44_vm0, %v1311_v0  ;;  %49 = vst.msk [vmem:[#allocation2 + $0x20] sm:$0xff] %vm44_vm0, %v1311_v0  ;;  %v50_v1 = vld [vmem:[%s1618_s0] sm:$0xff]  ;;  %v1069_v2 = vld [vmem:[%s1618_s0 + $0x8] sm:$0xff]  ;;  %s1313_s0 = smov 8   ;;  %vm104_vm3 = vcmask 64512  }
   0x2   :  { %45 = vst.msk [vmem:[#allocation2] sm:$0xff] %vm44_vm0, %v1311_v0  ;;  %46 = vst.msk [vmem:[#allocation2 + $0x8] sm:$0xff] %vm44_vm0, %v1311_v0  ;;  %v110_v3 = vld [vmem:[%s1619_s1 + $0x8] sm:$0xf]  ;;  %v109_v4 = vld [vmem:[%s1619_s1] sm:$0xff]  ;;  %s1314_s1 = smov 32  }
   0x3   :  { %47 = vst.msk [vmem:[#allocation2 + $0x10] sm:$0xff] %vm44_vm0, %v1311_v0  ;;  %1156 = vmatprep.subr.msk.mxu0 %vm131_vm2, %v110_v3  ;;  %vm118_vm4 = vcmask 97280   ;;  %v284_v33 = vld [vmem:[%s1620_s3 + $0x58] sm:$0xff]  ;;  %v283_v34 = vld [vmem:[%s1620_s3 + $0x50] sm:$0xff]  ;;  %v282_v35 = vld [vmem:[%s1620_s3 + $0x48] sm:$0xff]  ;;  %vm268_vm5 = vcmask 523264  }
   0x4   :  { %52 = vst.msk [vmem:[#allocation2 + $0x1] sm:$0xff] %vm51_vm1, %v50_v1  ;;  %55 = vst.msk [vmem:[#allocation2 + $0x11] sm:$0xff] %vm51_vm1, %v1069_v2  ;;  %1157 = vmatpush3.msk.msra.mxu0 %vm131_vm2, %v110_v3  ;;  %1166 = vmatprep.subr.mxu1 %v284_v33  ;;  %v281_v36 = vld [vmem:[%s1620_s3 + $0x40] sm:$0xff]  ;;  %v280_v37 = vld [vmem:[%s1620_s3 + $0x38] sm:$0xff]  ;;  %vm292_vm6 = vcmask 785408   ;;  %vm1316_vm7 = vmmov 0  }
   0x5   :  { %1158 = vmatprep.subr.mxu0 %v109_v4  ;;  %1167 = vmatpush3.msra.mxu1 %v284_v33  ;;  %v279_v38 = vld [vmem:[%s1620_s3 + $0x30] sm:$0xff]  ;;  %v278_v39 = vld [vmem:[%s1620_s3 + $0x28] sm:$0xff]  ;;  %v277_v40 = vld [vmem:[%s1620_s3 + $0x20] sm:$0xff] }
   0x6   :  { %1159 = vmatpush3.msra.mxu0 %v109_v4  ;;  %1168 = vmatprep.subr.mxu1 %v283_v34  ;;  %v276_v41 = vld [vmem:[%s1620_s3 + $0x18] sm:$0xff]  ;;  %v1070_v43 = vld [vmem:[%s1621_s2] ss:$0 sm:$0xff]  ;;  %v275_v44 = vld [vmem:[%s1620_s3 + $0x10] sm:$0xff]  ;;  %s1315_s2 = smov 64  }
   0x7   :  { %1169 = vmatpush3.msra.mxu1 %v283_v34  ;;  %v274_v45 = vld [vmem:[%s1620_s3 + $0x8] sm:$0xff]  ;;  %v273_v48 = vld [vmem:[%s1620_s3] sm:$0xff] }
   0x8   :  { %v63_v5 = vld [vmem:[#allocation2 + $0x19] sm:$0xff]  ;;  %1170 = vmatprep.subr.mxu1 %v282_v35 }
   0x9   :  { %78 = vrot.lane.b32.xlu1 %v63_v5, %s1312_s16  ;;  %v1411_v11 = vld [vmem:[#allocation2 + $0x1a] sm:$0xff]  ;;  %1171 = vmatpush3.msra.mxu1 %v282_v35 }
   0xa   :  { %v61_v6 = vld [vmem:[#allocation2 + $0x9] sm:$0xff]  ;;  %1172 = vmatprep.subr.mxu1 %v281_v36 }
   0xb   :  { %74 = vrot.lane.b32.xlu0 %v61_v6, %s1312_s16  ;;  %v64_v7 = vld [vmem:[#allocation2 + $0x2] sm:$0xff]  ;;  %v65_v9 = vld [vmem:[#allocation2 + $0xa] sm:$0xff]  ;;  %v66_v12 = vld [vmem:[#allocation2 + $0x12] sm:$0xff]  ;;  %1173 = vmatpush3.msra.mxu1 %v281_v36 }
   0xc   :  { %v60_v8 = vld [vmem:[#allocation2 + $0x1] sm:$0xff]  ;;  %v62_v10 = vld [vmem:[#allocation2 + $0x11] sm:$0xff]  ;;  %1174 = vmatprep.subr.mxu1 %v280_v37 }
   0xd   :  { %88 = vrot.lane.b32.xlu1 %v64_v7, %s1313_s0  ;;  %v56_v15 = vld [vmem:[#allocation2] sm:$0xff]  ;;  %v57_v18 = vld [vmem:[#allocation2 + $0x8] sm:$0xff]  ;;  %v58_v21 = vld [vmem:[#allocation2 + $0x10] sm:$0xff]  ;;  %1175 = vmatpush3.msra.mxu1 %v280_v37 }
   0xe   :  { %v59_v25 = vld [vmem:[#allocation2 + $0x18] sm:$0xff]  ;;  %1176 = vmatprep.subr.mxu1 %v279_v38 }
   0xf   :  { %72 = vrot.lane.b32.xlu0 %v60_v8, %s1312_s16  ;;  %1177 = vmatpush3.msra.mxu1 %v279_v38 }
  0x10   :  { %1178 = vmatprep.subr.mxu1 %v278_v39 }
  0x11   :  { %90 = vrot.lane.b32.xlu1 %v65_v9, %s1313_s0  ;;  %1179 = vmatpush3.msra.mxu1 %v278_v39 }
  0x12   :  { %1180 = vmatprep.subr.mxu1 %v277_v40 }
  0x13   :  { %76 = vrot.lane.b32.xlu0 %v62_v10, %s1312_s16  ;;  %1181 = vmatpush3.msra.mxu1 %v277_v40 }
  0x14   :  { %1182 = vmatprep.subr.mxu1 %v276_v41 }
  0x15   :  { %94 = vrot.lane.b32.xlu1 %v1411_v11, %s1313_s0  ;;  %1183 = vmatpush3.msra.mxu1 %v276_v41 }
  0x16   :  { %1184 = vmatprep.subr.mxu1 %v275_v44 }
  0x17   :  { %92 = vrot.lane.b32.xlu0 %v66_v12, %s1313_s0  ;;  %1185 = vmatpush3.msra.mxu1 %v275_v44 }
  0x18   :  { %1186 = vmatprep.subr.mxu1 %v274_v45 }
  0x19   :  { %238 = vrot.lane.b32.xlu1 %v61_v6, %s1314_s1  ;;  %1187 = vmatpush3.msra.mxu1 %v274_v45 }
  0x1a   :  { %1188 = vmatprep.subr.mxu1 %v273_v48 }
  0x1b   :  { %1189 = vmatpush3.msra.mxu1 %v273_v48 }
  0x1d   :  { %242 = vrot.lane.b32.xlu1 %v63_v5, %s1314_s1 }
  0x7b   :  { %v79_v13 = vpop.permute.xlu1 %78 }
  0x7c   :  { %v103_v28 = vsel %vm51_vm1, %v59_v25, %v79_v13  ;;  %v391_v25 = vld [vmem:[%s1624_s6 + $0x18] sm:$0xff] }
  0x7d   :  { %v75_v14 = vpop.permute.xlu0 %74 }
  0x7e   :  { %v101_v22 = vsel %vm51_vm1, %v57_v18, %v75_v14  ;;  %v395_v14 = vld [vmem:[%s1622_s5 + $0x18] sm:$0xff] }
  0x7f   :  { %v89_v16 = vpop.permute.xlu1 %88  ;;  %1196 = vmatprep.subr.mxu0 %v395_v14 }
  0x81   :  { %v73_v17 = vpop.permute.xlu0 %72 }
  0x82   :  { %v100_v19 = vsel %vm51_vm1, %v56_v15, %v73_v17  ;;  %v394_v15 = vld [vmem:[%s1622_s5 + $0x10] sm:$0xff]  ;;  %v392_v17 = vld [vmem:[%s1622_s5] sm:$0xff] }
  0x83   :  { %v105_v20 = vsel %vm104_vm3, %v100_v19, %v89_v16  ;;  %v91_v23 = vpop.permute.xlu1 %90  ;;  %v393_v16 = vld [vmem:[%s1622_s5 + $0x8] sm:$0xff]  ;;  %v1076_v19 = vld [vmem:[%s1623_s4] ss:$0 sm:$0xff] }
  0x84   :  { %1160 = vmatprep.mubr.msk.f32.mxu0 %vm118_vm4, %v105_v20  ;;  %v106_v26 = vsel %vm104_vm3, %v101_v22, %v91_v23 }
  0x85   :  { %v77_v24 = vpop.permute.xlu0 %76  ;;  %1161 = vmatmul.mubr.msk.f32.vlgmr.msra.gmra.mxu0 %vm118_vm4, %v106_v26  ;;  %v390_v26 = vld [vmem:[%s1624_s6 + $0x10] sm:$0xff] }
  0x86   :  { %v102_v27 = vsel %vm51_vm1, %v58_v21, %v77_v24  ;;  %1197 = vmatpush3.msra.mxu0 %v395_v14 }
  0x87   :  { %v95_v29 = vpop.permute.xlu1 %94  ;;  %1198 = vmatprep.subr.mxu0 %v394_v15 }
  0x88   :  { %v108_v31 = vsel %vm104_vm3, %v103_v28, %v95_v29  ;;  %1199 = vmatpush3.msra.mxu0 %v394_v15  ;;  %v388_v28 = vld [vmem:[%s1624_s6] sm:$0xff] }
  0x89   :  { %v93_v30 = vpop.permute.xlu0 %92  ;;  %1200 = vmatprep.subr.mxu0 %v393_v16  ;;  %v1081_v29 = vld [vmem:[%s1625_s7] ss:$0 sm:$0xff] }
  0x8a   :  { %v107_v32 = vsel %vm104_vm3, %v102_v27, %v93_v30  ;;  %1201 = vmatpush3.msra.mxu0 %v393_v16  ;;  %v389_v27 = vld [vmem:[%s1624_s6 + $0x8] sm:$0xff]  ;;  %v1087_v15 = vld [vmem:[%s1628_s10] ss:$0 sm:$0xff] }
  0x8b   :  { %1163 = vmatprep.mubr.msk.f32.mxu0 %vm118_vm4, %v107_v32  ;;  %v239_v57 = vpop.permute.xlu1 %238  ;;  %1202 = vmatprep.subr.mxu0 %v392_v17 }
  0x8c   :  { %1164 = vmatmul.mubr.msk.f32.gmra.mxu0 %vm118_vm4, %v108_v31 }
  0x8d   :  { %1203 = vmatpush3.msra.mxu0 %v392_v17 }
  0x8e   :  { %1207 = vmatprep.subr.mxu0 %v1311_v0 }
  0x8f   :  { %v243_v59 = vpop.permute.xlu1 %242 }
 0x145   :  { %v1162_v42 = vpop.f32.mrf.mxu0 }
 0x147   :  { %v201_v46 = vpop.f32.mrf.mxu0 }
 0x148   :  { %v202_v47 = vadd.f32 %v1070_v43, %v201_v46 }
 0x14a   :  { %218 = vst.msk [vmem:[#allocation2 + $0x1] sm:$0xff] %vm44_vm0, %v202_v47 }
 0x14c   :  { %v1165_v49 = vpop.f32.mrf.mxu0 }
 0x14e   :  { %v210_v50 = vpop.f32.mrf.mxu0 }
 0x14f   :  { %v211_v51 = vadd.f32 %v1070_v43, %v210_v50 }
 0x151   :  { %219 = vst.msk [vmem:[#allocation2 + $0x11] sm:$0xff] %vm44_vm0, %v211_v51  ;;  %v224_v52 = vld [vmem:[#allocation2 + $0x1] sm:$0xff] }
 0x152   :  { %236 = vrot.lane.b32.xlu0 %v224_v52, %s1314_s1  ;;  %v228_v53 = vld [vmem:[#allocation2 + $0x2] sm:$0xff] }
 0x153   :  { %v221_v60 = vld [vmem:[#allocation2 + $0x8] sm:$0xff]  ;;  %v220_v61 = vld [vmem:[#allocation2] sm:$0xff] }
 0x154   :  { %v265_v1 = vsel %vm44_vm0, %v221_v60, %v239_v57 }
 0x156   :  { %252 = vrot.lane.b32.xlu0 %v228_v53, %s1315_s2 }
 0x158   :  { %v229_v54 = vld [vmem:[#allocation2 + $0xa] sm:$0xff]  ;;  %v230_v56 = vld [vmem:[#allocation2 + $0x12] sm:$0xff] }
 0x159   :  { %254 = vrot.lane.b32.xlu1 %v229_v54, %s1315_s2  ;;  %v226_v55 = vld [vmem:[#allocation2 + $0x11] sm:$0xff] }
 0x15a   :  { %240 = vrot.lane.b32.xlu0 %v226_v55, %s1314_s1  ;;  %v223_v6 = vld [vmem:[#allocation2 + $0x18] sm:$0xff]  ;;  %v222_v7 = vld [vmem:[#allocation2 + $0x10] sm:$0xff] }
 0x15d   :  { %258 = vrot.lane.b32.xlu1 %v1411_v11, %s1315_s2  ;;  %v267_v11 = vsel %vm44_vm0, %v223_v6, %v243_v59  ;;  %v683_v6 = vld [vmem:[%s1627_s9 + $0x8] sm:$0xff] }
 0x15e   :  { %256 = vrot.lane.b32.xlu0 %v230_v56, %s1315_s2 }
 0x1c4   :  { %v237_v58 = vpop.permute.xlu0 %236 }
 0x1c5   :  { %v264_v62 = vsel %vm44_vm0, %v220_v61, %v237_v58 }
 0x1c8   :  { %v253_v63 = vpop.permute.xlu0 %252 }
 0x1c9   :  { %v269_v3 = vsel %vm268_vm5, %v264_v62, %v253_v63 }
 0x1ca   :  { %1190 = vmatprep.mubr.msk.f32.mxu1 %vm292_vm6, %v269_v3  ;;  %v685_v3 = vld [vmem:[%s1627_s9 + $0x18] sm:$0xff] }
 0x1cb   :  { %v255_v2 = vpop.permute.xlu1 %254 }
 0x1cc   :  { %v270_v4 = vsel %vm268_vm5, %v265_v1, %v255_v2  ;;  %v241_v5 = vpop.permute.xlu0 %240  ;;  %v689_v1 = vld [vmem:[%s1626_s8 + $0x18] sm:$0xff]  ;;  %v688_v2 = vld [vmem:[%s1626_s8 + $0x10] sm:$0xff] }
 0x1cd   :  { %1191 = vmatmul.mubr.msk.f32.vlgmr.msra.gmra.mxu1 %vm292_vm6, %v270_v4  ;;  %v266_v9 = vsel %vm44_vm0, %v222_v7, %v241_v5  ;;  %1229 = vmatprep.subr.mxu1 %v689_v1  ;;  %v684_v4 = vld [vmem:[%s1627_s9 + $0x10] sm:$0xff]  ;;  %v687_v5 = vld [vmem:[%s1626_s8 + $0x8] sm:$0xff]  ;;  %v686_v7 = vld [vmem:[%s1626_s8] sm:$0xff] }
 0x1ce   :  { %1230 = vmatpush3.msra.mxu1 %v689_v1 }
 0x1cf   :  { %v259_v8 = vpop.permute.xlu1 %258  ;;  %1231 = vmatprep.subr.mxu1 %v688_v2 }
 0x1d0   :  { %v257_v10 = vpop.permute.xlu0 %256  ;;  %v272_v13 = vsel %vm268_vm5, %v267_v11, %v259_v8  ;;  %1232 = vmatpush3.msra.mxu1 %v688_v2 }
 0x1d1   :  { %v271_v12 = vsel %vm268_vm5, %v266_v9, %v257_v10  ;;  %1233 = vmatprep.subr.mxu1 %v687_v5  ;;  %v682_v9 = vld [vmem:[%s1627_s9] sm:$0xff] }
 0x1d2   :  { %1193 = vmatprep.mubr.msk.f32.mxu1 %vm292_vm6, %v271_v12  ;;  %1234 = vmatpush3.msra.mxu1 %v687_v5 }
 0x1d3   :  { %1194 = vmatmul.mubr.msk.f32.gmra.mxu1 %vm292_vm6, %v272_v13  ;;  %1235 = vmatprep.subr.mxu1 %v686_v7 }
 0x1d4   :  { %1236 = vmatpush3.msra.mxu1 %v686_v7 }
 0x1d5   :  { %1251 = vmatprep.subr.mxu1 %v1311_v0 }
 0x28d   :  { %v1192_v18 = vpop.f32.mrf.mxu1 }
 0x28f   :  { %v371_v20 = vpop.f32.mrf.mxu1 }
 0x290   :  { %v372_v21 = vadd.f32 %v1076_v19, %v371_v20 }
 0x292   :  { %1204 = vmatprep.mubr.msk.f32.mxu0 %vm44_vm0, %v372_v21 }
 0x293   :  { %v1195_v22 = vpop.f32.mrf.mxu1 }
 0x295   :  { %v380_v23 = vpop.f32.mrf.mxu1 }
 0x296   :  { %v381_v24 = vadd.f32 %v1076_v19, %v380_v23 }
 0x298   :  { %1205 = vmatmul.mubr.msk.f32.vlgmr.msra.gmra.mxu0 %vm44_vm0, %v381_v24 }
 0x299   :  { %1208 = vmatpush3.msra.mxu0 %v391_v25  ;;  %1215 = vmatprep.mubr.msk.f32.mxu0 %vm1316_vm7, %v1311_v0 }
 0x29a   :  { %1209 = vmatprep.subr.mxu0 %v1311_v0 }
 0x29b   :  { %1210 = vmatpush3.msra.mxu0 %v390_v26 }
 0x29c   :  { %1211 = vmatprep.subr.mxu0 %v1311_v0 }
 0x29d   :  { %1212 = vmatpush3.msra.mxu0 %v389_v27 }
 0x29e   :  { %1213 = vmatprep.subr.mxu0 %v1311_v0 }
 0x29f   :  { %1214 = vmatpush3.msra.mxu0 %v388_v28 }
 0x2a0   :  { %1216 = vmatmul.mubr.f32.vlgmr.msra.gmra.mxu0 %v1311_v0  ;;  %1218 = vmatprep.subr.mxu0 %v1311_v0 }
 0x2a1   :  { %1219 = vmatpush3.msra.mxu0 %v391_v25  ;;  %1226 = vmatprep.mubr.msk.f32.mxu0 %vm1316_vm7, %v1311_v0 }
 0x2a2   :  { %1220 = vmatprep.subr.mxu0 %v1311_v0 }
 0x2a3   :  { %1221 = vmatpush3.msra.mxu0 %v390_v26 }
 0x2a4   :  { %1222 = vmatprep.subr.mxu0 %v1311_v0 }
 0x2a5   :  { %1223 = vmatpush3.msra.mxu0 %v389_v27 }
 0x2a6   :  { %1224 = vmatprep.subr.mxu0 %v1311_v0 }
 0x2a7   :  { %1225 = vmatpush3.msra.mxu0 %v388_v28 }
 0x2a8   :  { %1240 = vmatprep.subr.mxu0 %v1311_v0 }
 0x358   :  { %v1206_v30 = vpop.f32.mrf.mxu0 }
 0x359   :  { %v481_v31 = vadd.f32 %v1206_v30, %v1081_v29 }
 0x35a   :  { %v475_v32 = vpop.f32.mrf.mxu0 }
 0x35b   :  { %v476_v33 = vadd.f32 %v1081_v29, %v475_v32 }
 0x360   :  { %v553_v34 = vpop.f32.mrf.mxu0 }
 0x361   :  { %v557_v35 = vadd.f32 %v553_v34, %v476_v33 }
 0x362   :  { %v1217_v36 = vpop.f32.mrf.mxu0 }
 0x363   :  { %1279 = vtanh.f32 %v557_v35  ;;  %v1084_v38 = vmul.f32 -1.442695, %v557_v35 }
 0x365   :  { %1281 = vpow2.f32 %v1084_v38 }
 0x370   :  { %v1280_v37 = vpop.eup %1279 }
 0x371   :  { %567 = vrot.lane.b32.xlu0 %v1280_v37, %s1315_s2 }
 0x372   :  { %v1282_v39 = vpop.eup %1281 }
 0x373   :  { %v561_v40 = vadd.f32 1.0, %v1282_v39 }
 0x375   :  { %1283 = vrcp.f32 %v561_v40 }
 0x382   :  { %v1284_v41 = vpop.eup %1283 }
 0x383   :  { %v565_v44 = vmul.f32 0.0, %v1284_v41 }
 0x3e3   :  { %v568_v42 = vpop.permute.xlu0 %567 }
 0x3e4   :  { %v570_v43 = vmul.f32 %v1284_v41, %v568_v42 }
 0x3e6   :  { %572 = vrot.lane.b32.xlu1 %v570_v43, %s1314_s1 }
 0x458   :  { %v573_v45 = vpop.permute.xlu1 %572 }
 0x459   :  { %v575_v46 = vadd.f32 %v573_v45, %v565_v44 }
 0x45b   :  { %1285 = vtanh.f32 %v575_v46 }
 0x468   :  { %v1286_v47 = vpop.eup %1285 }
 0x469   :  { %578 = vrot.lane.b32.xlu0 %v1286_v47, %s1315_s2  ;;  %v975_v47 = vld [vmem:[%s1629_s11 + $0x18] sm:$0xff] }
 0x4db   :  { %v579_v48 = vpop.permute.xlu0 %578 }
 0x4dc   :  { %v581_v49 = vmul.f32 %v1284_v41, %v579_v48  ;;  %v974_v48 = vld [vmem:[%s1629_s11 + $0x10] sm:$0xff] }
 0x4de   :  { %583 = vrot.lane.b32.xlu1 %v581_v49, %s1314_s1  ;;  %v973_v49 = vld [vmem:[%s1629_s11 + $0x8] sm:$0xff] }
 0x550   :  { %v584_v50 = vpop.permute.xlu1 %583 }
 0x551   :  { %1227 = vmatmul.mubr.msk.f32.vlgmr.msra.gmra.mxu0 %vm44_vm0, %v584_v50  ;;  %1237 = vmatprep.mubr.msk.f32.mxu1 %vm44_vm0, %v584_v50  ;;  %v972_v50 = vld [vmem:[%s1629_s11] sm:$0xff] }
 0x552   :  { %1248 = vmatprep.mubr.msk.f32.mxu0 %vm1316_vm7, %v1311_v0  ;;  %1241 = vmatpush3.msra.mxu0 %v685_v3 }
 0x553   :  { %1242 = vmatprep.subr.mxu0 %v1311_v0 }
 0x554   :  { %1243 = vmatpush3.msra.mxu0 %v684_v4 }
 0x555   :  { %1244 = vmatprep.subr.mxu0 %v1311_v0 }
 0x556   :  { %1245 = vmatpush3.msra.mxu0 %v683_v6 }
 0x557   :  { %1246 = vmatprep.subr.mxu0 %v1311_v0 }
 0x558   :  { %1247 = vmatpush3.msra.mxu0 %v682_v9 }
 0x559   :  { %1249 = vmatmul.mubr.f32.vlgmr.msra.gmra.mxu0 %v1311_v0  ;;  %1262 = vmatprep.subr.mxu0 %v975_v47 }
 0x55a   :  { %1263 = vmatpush3.msra.mxu0 %v975_v47 }
 0x55b   :  { %1264 = vmatprep.subr.mxu0 %v974_v48 }
 0x55c   :  { %1265 = vmatpush3.msra.mxu0 %v974_v48 }
 0x55d   :  { %1266 = vmatprep.subr.mxu0 %v973_v49 }
 0x55e   :  { %1267 = vmatpush3.msra.mxu0 %v973_v49 }
 0x55f   :  { %1268 = vmatprep.subr.mxu0 %v972_v50 }
 0x560   :  { %1269 = vmatpush3.msra.mxu0 %v972_v50 }
 0x611   :  { %v653_v51 = vpop.f32.mrf.mxu0 }
 0x612   :  { %v657_v52 = vadd.f32 %v653_v51, %v481_v31 }
 0x613   :  { %v1228_v53 = vpop.f32.mrf.mxu0 }
 0x614   :  { %1287 = vtanh.f32 %v657_v52  ;;  %v1086_v55 = vmul.f32 -1.442695, %v657_v52 }
 0x616   :  { %1289 = vpow2.f32 %v1086_v55  ;;  %v1093_v55 = vld [vmem:[%s1630_s12] ss:$0 sm:$0xff] }
 0x619   :  { %v843_v13 = vpop.f32.mrf.mxu0 }
 0x61b   :  { %v1250_v14 = vpop.f32.mrf.mxu0 }
 0x621   :  { %v1288_v54 = vpop.eup %1287 }
 0x622   :  { %667 = vrot.lane.b32.xlu0 %v1288_v54, %s1315_s2 }
 0x623   :  { %v1290_v56 = vpop.eup %1289 }
 0x624   :  { %v661_v57 = vadd.f32 1.0, %v1290_v56 }
 0x626   :  { %1291 = vrcp.f32 %v661_v57 }
 0x633   :  { %v1292_v58 = vpop.eup %1291 }
 0x634   :  { %v665_v61 = vmul.f32 %v1292_v58, %v575_v46 }
 0x694   :  { %v668_v59 = vpop.permute.xlu0 %667 }
 0x695   :  { %v670_v60 = vmul.f32 %v1292_v58, %v668_v59 }
 0x697   :  { %672 = vrot.lane.b32.xlu1 %v670_v60, %s1314_s1 }
 0x709   :  { %v673_v62 = vpop.permute.xlu1 %672 }
 0x70a   :  { %v675_v63 = vadd.f32 %v673_v62, %v665_v61 }
 0x70c   :  { %1293 = vtanh.f32 %v675_v63 }
 0x719   :  { %v1294_v8 = vpop.eup %1293 }
 0x71a   :  { %678 = vrot.lane.b32.xlu0 %v1294_v8, %s1315_s2 }
 0x78c   :  { %v679_v10 = vpop.permute.xlu0 %678 }
 0x78d   :  { %v681_v11 = vmul.f32 %v1292_v58, %v679_v10 }
 0x78f   :  { %698 = vrot.lane.b32.xlu1 %v681_v11, %s1314_s1 }
 0x801   :  { %v699_v12 = vpop.permute.xlu1 %698 }
 0x802   :  { %1238 = vmatmul.mubr.msk.f32.vlgmr.msra.gmra.mxu1 %vm44_vm0, %v699_v12 }
 0x803   :  { %1252 = vmatpush3.msra.mxu1 %v685_v3  ;;  %1259 = vmatprep.mubr.msk.f32.mxu1 %vm1316_vm7, %v1311_v0 }
 0x804   :  { %1253 = vmatprep.subr.mxu1 %v1311_v0 }
 0x805   :  { %1254 = vmatpush3.msra.mxu1 %v684_v4 }
 0x806   :  { %1255 = vmatprep.subr.mxu1 %v1311_v0 }
 0x807   :  { %1256 = vmatpush3.msra.mxu1 %v683_v6 }
 0x808   :  { %1257 = vmatprep.subr.mxu1 %v1311_v0 }
 0x809   :  { %1258 = vmatpush3.msra.mxu1 %v682_v9 }
 0x8c2   :  { %v1239_v16 = vpop.f32.mrf.mxu1 }
 0x8c3   :  { %v774_v17 = vadd.f32 %v1239_v16, %v1087_v15 }
 0x8c4   :  { %v768_v18 = vpop.f32.mrf.mxu1 }
 0x8c5   :  { %v769_v19 = vadd.f32 %v1087_v15, %v768_v18 }
 0x8c7   :  { %v847_v20 = vadd.f32 %v843_v13, %v769_v19 }
 0x8c9   :  { %1295 = vtanh.f32 %v847_v20  ;;  %v1090_v22 = vmul.f32 -1.442695, %v847_v20 }
 0x8cb   :  { %1297 = vpow2.f32 %v1090_v22 }
 0x8d6   :  { %v1296_v21 = vpop.eup %1295 }
 0x8d7   :  { %857 = vrot.lane.b32.xlu0 %v1296_v21, %s1315_s2 }
 0x8d8   :  { %v1298_v23 = vpop.eup %1297 }
 0x8d9   :  { %v851_v0 = vadd.f32 1.0, %v1298_v23 }
 0x8db   :  { %1299 = vrcp.f32 %v851_v0 }
 0x8e8   :  { %v1300_v24 = vpop.eup %1299 }
 0x8e9   :  { %v855_v27 = vmul.f32 0.0, %v1300_v24 }
 0x949   :  { %v858_v25 = vpop.permute.xlu0 %857 }
 0x94a   :  { %v860_v26 = vmul.f32 %v1300_v24, %v858_v25 }
 0x94c   :  { %862 = vrot.lane.b32.xlu1 %v860_v26, %s1314_s1 }
 0x9be   :  { %v863_v28 = vpop.permute.xlu1 %862 }
 0x9bf   :  { %v865_v29 = vadd.f32 %v863_v28, %v855_v27 }
 0x9c1   :  { %1301 = vtanh.f32 %v865_v29 }
 0x9ce   :  { %v1302_v30 = vpop.eup %1301 }
 0x9cf   :  { %868 = vrot.lane.b32.xlu0 %v1302_v30, %s1315_s2 }
 0xa41   :  { %v869_v31 = vpop.permute.xlu0 %868 }
 0xa42   :  { %v871_v32 = vmul.f32 %v1300_v24, %v869_v31 }
 0xa44   :  { %873 = vrot.lane.b32.xlu1 %v871_v32, %s1314_s1 }
 0xab6   :  { %v874_v33 = vpop.permute.xlu1 %873 }
 0xab7   :  { %1260 = vmatmul.mubr.msk.f32.vlgmr.msra.gmra.mxu1 %vm44_vm0, %v874_v33  ;;  %1270 = vmatprep.mubr.msk.f32.mxu0 %vm44_vm0, %v874_v33 }
 0xb77   :  { %v943_v34 = vpop.f32.mrf.mxu1 }
 0xb78   :  { %v947_v35 = vadd.f32 %v943_v34, %v774_v17 }
 0xb79   :  { %v1261_v36 = vpop.f32.mrf.mxu1 }
 0xb7a   :  { %1303 = vtanh.f32 %v947_v35  ;;  %v1092_v38 = vmul.f32 -1.442695, %v947_v35 }
 0xb7c   :  { %1305 = vpow2.f32 %v1092_v38 }
 0xb87   :  { %v1304_v37 = vpop.eup %1303 }
 0xb88   :  { %957 = vrot.lane.b32.xlu0 %v1304_v37, %s1315_s2 }
 0xb89   :  { %v1306_v39 = vpop.eup %1305 }
 0xb8a   :  { %v951_v40 = vadd.f32 1.0, %v1306_v39 }
 0xb8c   :  { %1307 = vrcp.f32 %v951_v40 }
 0xb99   :  { %v1308_v41 = vpop.eup %1307 }
 0xb9a   :  { %v955_v44 = vmul.f32 %v1308_v41, %v865_v29 }
 0xbfa   :  { %v958_v42 = vpop.permute.xlu0 %957 }
 0xbfb   :  { %v960_v43 = vmul.f32 %v1308_v41, %v958_v42 }
 0xbfd   :  { %962 = vrot.lane.b32.xlu1 %v960_v43, %s1314_s1 }
 0xc6f   :  { %v963_v45 = vpop.permute.xlu1 %962 }
 0xc70   :  { %v965_v46 = vadd.f32 %v963_v45, %v955_v44 }
 0xc72   :  { %1309 = vtanh.f32 %v965_v46 }
 0xc7f   :  { %v1310_v51 = vpop.eup %1309 }
 0xc80   :  { %968 = vrot.lane.b32.xlu0 %v1310_v51, %s1315_s2 }
 0xcf2   :  { %v969_v52 = vpop.permute.xlu0 %968 }
 0xcf3   :  { %v971_v53 = vmul.f32 %v1308_v41, %v969_v52 }
 0xcf5   :  { %984 = vrot.lane.b32.xlu1 %v971_v53, %s1314_s1 }
 0xd67   :  { %v985_v54 = vpop.permute.xlu1 %984 }
 0xd68   :  { %1271 = vmatmul.mubr.msk.f32.vlgmr.msra.gmra.mxu0 %vm44_vm0, %v985_v54 }
 0xe28   :  { %v1272_v56 = vpop.f32.mrf.mxu0 }
 0xe29   :  { %v1060_v57 = vadd.f32 %v1272_v56, %v1093_v55 }
 0xe2a   :  { %v1054_v58 = vpop.f32.mrf.mxu0 }
 0xe2b   :  { %1064 = vst.msk [vmem:[%s1631_s13 + $0x8] sm:$0xff] %vm104_vm3, %v1060_v57  ;;  %v1055_v59 = vadd.f32 %v1093_v55, %v1054_v58 }
 0xe2d   :  { %1063 = vst.msk [vmem:[%s1631_s13] sm:$0xff] %vm104_vm3, %v1055_v59 }

</bundles_post_ra>
